<compile_context>
chip_gen: v7x
topology: tpu7x:2x2x1
jax: 0.10.0
libtpu: 0.0.40
codegen_flags: <defaults>
</compile_context>

<pallas_src>
import jax
import jax.numpy as jnp
from jax.experimental import pallas as pl
from jax.experimental.pallas import tpu as pltpu


def recsys_kernel(uidx_ref, pidx_ref, scores_ref, b_ref, o_ref):
    # uidx_ref   : [1, TB]   int32  user row ids (lane-dense)
    # pidx_ref   : [1, TB]   int32  power row ids, already offset by NU
    # scores_ref : [1, S]    f32    concat(user_table@Wu, power_table@Wp), 0-padded
    # b_ref      : [1, 1]    f32    bias scalar in SMEM
    # o_ref      : [1, TB]   f32    lane-dense output
    S = scores_ref.shape[1]
    TB = uidx_ref.shape[1]

    uidx = uidx_ref[...]                                               # [1, TB]
    pidx = pidx_ref[...]                                               # [1, TB]

    # Combined one-hot, transposed so batch stays on lanes: [S, TB].
    # Exactly two ones per column (user row + offset power row).
    row = jax.lax.broadcasted_iota(jnp.int32, (S, TB), 0)
    onehot_t = ((row == uidx) | (row == pidx)).astype(jnp.float32)     # [S, TB]

    # Single MXU call: [1, S] @ [S, TB] -> [1, TB]; add SMEM scalar bias.
    out = jnp.dot(scores_ref[...], onehot_t,
                  preferred_element_type=jnp.float32)                  # [1, TB]
    o_ref[...] = out + b_ref[0, 0]


def _round_up(x, m):
    return ((x + m - 1) // m) * m


def recommender_forward(user, power, user_table, power_table, fc_w, fc_b,
                        *, max_tile=1024):
    """user, power: int [B]; returns f32 [B] (matches torch .squeeze())."""
    B = user.shape[0]
    NU, E = user_table.shape
    NP = power_table.shape[0]

    # ---- Fold the Linear into the tables (batch-independent, O((NU+NP)*E)).
    # torch Linear: y = x @ W.T + b, W: [1, 2E]  ->  column weight [2E, 1].
    w_col = fc_w.reshape(2 * E, 1).astype(jnp.float32)
    scores_u = user_table.astype(jnp.float32) @ w_col[:E, :]           # [NU, 1]
    scores_p = power_table.astype(jnp.float32) @ w_col[E:, :]          # [NP, 1]
    S = NU + NP
    S_pad = _round_up(S, 8)                                            # sublane pad
    scores = jnp.concatenate([scores_u, scores_p], axis=0).reshape(1, S)
    scores = jnp.pad(scores, ((0, 0), (0, S_pad - S)))                 # [1, S_pad]

    # ---- Lane-dense batch layout: pad to a multiple of 128 lanes, tile at
    #      max_tile (multiple of 128) so every tile store is unmasked.
    TB = min(max_tile, _round_up(B, 128))
    B_pad = _round_up(B, TB)

    uidx = jnp.zeros((1, B_pad), jnp.int32).at[0, :B].set(user.astype(jnp.int32))
    pidx = jnp.full((1, B_pad), NU, jnp.int32).at[0, :B].set(
        power.astype(jnp.int32) + NU)
    bias = fc_b.reshape(1, 1).astype(jnp.float32)

    out = pl.pallas_call(
        recsys_kernel,
        out_shape=jax.ShapeDtypeStruct((1, B_pad), jnp.float32),
        grid=(B_pad // TB,),
        in_specs=[
            pl.BlockSpec((1, TB), lambda i: (0, i)),                   # user ids
            pl.BlockSpec((1, TB), lambda i: (0, i)),                   # power ids
            pl.BlockSpec((1, S_pad), lambda i: (0, 0)),                # scores (resident)
            pl.BlockSpec((1, 1), lambda i: (0, 0),
                         memory_space=pltpu.MemorySpace.SMEM),         # bias scalar
        ],
        out_specs=pl.BlockSpec((1, TB), lambda i: (0, i)),
        compiler_params=pltpu.CompilerParams(
            dimension_semantics=("parallel",),
            vmem_limit_bytes=32 * 1024 * 1024,
        ),
    )(uidx, pidx, scores, bias)

    return out[0, :B]                      # squeeze() -> [B]


if __name__ == "__main__":
    # Small, module-consistent shapes.
    num_users, num_powers, emb_size = 16, 12, 32
    batch = 8

    key = jax.random.PRNGKey(0)
    k_ut, k_pt, k_w, k_b, k_u, k_p = jax.random.split(key, 6)

    # Embedding tables: uniform_(0, 0.05), as in the module's __init__.
    user_table = jax.random.uniform(k_ut, (num_users, emb_size),
                                    jnp.float32, 0.0, 0.05)
    power_table = jax.random.uniform(k_pt, (num_powers, emb_size),
                                     jnp.float32, 0.0, 0.05)

    # nn.Linear(2E, 1) default init: U(-1/sqrt(2E), 1/sqrt(2E)).
    bound = 1.0 / jnp.sqrt(jnp.float32(2 * emb_size))
    fc_w = jax.random.uniform(k_w, (1, 2 * emb_size), jnp.float32, -bound, bound)
    fc_b = jax.random.uniform(k_b, (1,), jnp.float32, -bound, bound)

    # Index inputs.
    user = jax.random.randint(k_u, (batch,), 0, num_users, jnp.int32)
    power = jax.random.randint(k_p, (batch,), 0, num_powers, jnp.int32)

    out = recommender_forward(user, power, user_table, power_table, fc_w, fc_b)
    out = jax.block_until_ready(out)

    # Pure-JAX reference of the PyTorch forward.
    ue = user_table[user]                                  # [B, E]
    pe = power_table[power]                                # [B, E]
    x = jnp.concatenate([ue, pe], axis=1)                  # [B, 2E]
    ref = (x @ fc_w.T + fc_b).squeeze()                    # [B]

    assert out.shape == (batch,)
    assert jnp.allclose(out, ref, atol=1e-5, rtol=1e-5)
    print("KERNEL_OK")
</pallas_src>

<mosaic_0001>
module attributes {stable_mosaic.version = 11 : i64} {
  func.func @recsys_kernel(%arg0: i32, %arg1: memref<1x128xi32, #tpu.memory_space<vmem>>, %arg2: memref<1x128xi32, #tpu.memory_space<vmem>>, %arg3: memref<1x32xf32, #tpu.memory_space<vmem>>, %arg4: memref<1x1xf32, #tpu.memory_space<smem>>, %arg5: memref<1x128xf32, #tpu.memory_space<vmem>>) attributes {dimension_semantics = [#tpu.dimension_semantics<parallel>], iteration_bounds = array<i64: 1>, scalar_prefetch = 0 : i64, scratch_operands = 0 : i64, tpu.core_type = #tpu.core_type<tc>, window_params = [{transform_indices = @transform_0, window_bounds = array<i64: 1, 128>}, {transform_indices = @transform_1, window_bounds = array<i64: 1, 128>}, {pipeline_mode = #tpu.pipeline_mode<synchronous>, transform_indices = @transform_2, window_bounds = array<i64: 1, 32>}, {transform_indices = @transform_3, window_bounds = array<i64: 1, 1>}, {transform_indices = @transform_4, window_bounds = array<i64: 1, 128>}]} {
    %c0 = arith.constant 0 : index
    %c0_0 = arith.constant 0 : index
    %0 = vector.load %arg1[%c0, %c0_0] : memref<1x128xi32, #tpu.memory_space<vmem>>, vector<1x128xi32>
    %c0_1 = arith.constant 0 : index
    %c0_2 = arith.constant 0 : index
    %1 = vector.load %arg2[%c0_1, %c0_2] : memref<1x128xi32, #tpu.memory_space<vmem>>, vector<1x128xi32>
    %2 = tpu.iota {dimensions = array<i32: 0>} : vector<32x128xi32>
    %3 = vector.broadcast %0 : vector<1x128xi32> to vector<32x128xi32>
    %4 = arith.cmpi eq, %2, %3 : vector<32x128xi32>
    %5 = vector.broadcast %1 : vector<1x128xi32> to vector<32x128xi32>
    %6 = arith.cmpi eq, %2, %5 : vector<32x128xi32>
    %7 = arith.ori %4, %6 : vector<32x128xi1>
    %8 = arith.extui %7 : vector<32x128xi1> to vector<32x128xi32>
    %9 = arith.sitofp %8 : vector<32x128xi32> to vector<32x128xf32>
    %c0_3 = arith.constant 0 : index
    %c0_4 = arith.constant 0 : index
    %10 = vector.load %arg3[%c0_3, %c0_4] : memref<1x32xf32, #tpu.memory_space<vmem>>, vector<1x32xf32>
    %cst = arith.constant dense<0.000000e+00> : vector<1x128xf32>
    %11 = tpu.matmul %10, %9, %cst {dimension_numbers = #tpu.dot_dimension_numbers<[1], [0], [0], [1], [0, 0, 1, 1], [], []>} : vector<1x32xf32>, vector<32x128xf32>, vector<1x128xf32> -> vector<1x128xf32>
    %c0_5 = arith.constant 0 : index
    %c0_6 = arith.constant 0 : index
    %12 = memref.load %arg4[%c0_5, %c0_6] : memref<1x1xf32, #tpu.memory_space<smem>>
    %13 = vector.broadcast %12 : f32 to vector<1x128xf32>
    %14 = arith.addf %11, %13 : vector<1x128xf32>
    %c0_7 = arith.constant 0 : index
    %c0_8 = arith.constant 0 : index
    %15 = vector.load %arg5[%c0_7, %c0_8] : memref<1x128xf32, #tpu.memory_space<vmem>>, vector<1x128xf32>
    tpu.vector_store %arg5[%c0_7, %c0_8], %14 {strides = array<i32>} : memref<1x128xf32, #tpu.memory_space<vmem>>, vector<1x128xf32>,
    return
  }
  func.func @transform_0(%arg0: i32) -> (i32, i32) {
    %c0_i32 = arith.constant 0 : i32
    %c0_i32_0 = arith.constant 0 : i32
    return %c0_i32, %arg0 : i32, i32
  }
  func.func @transform_1(%arg0: i32) -> (i32, i32) {
    %c0_i32 = arith.constant 0 : i32
    %c0_i32_0 = arith.constant 0 : i32
    return %c0_i32, %arg0 : i32, i32
  }
  func.func @transform_2(%arg0: i32) -> (i32, i32) {
    %c0_i32 = arith.constant 0 : i32
    %c0_i32_0 = arith.constant 0 : i32
    %c0_i32_1 = arith.constant 0 : i32
    return %c0_i32, %c0_i32_0 : i32, i32
  }
  func.func @transform_3(%arg0: i32) -> (i32, i32) {
    %c0_i32 = arith.constant 0 : i32
    %c0_i32_0 = arith.constant 0 : i32
    %c0_i32_1 = arith.constant 0 : i32
    return %c0_i32, %c0_i32_0 : i32, i32
  }
  func.func @transform_4(%arg0: i32) -> (i32, i32) {
    %c0_i32 = arith.constant 0 : i32
    %c0_i32_0 = arith.constant 0 : i32
    return %c0_i32, %arg0 : i32, i32
  }
}

</mosaic_0001>

<bundles_post_ra>
// kernel: tpu_custom_call.1
= control target key start
LH: loop header
LB: loop body
LE: loop exit
PB: predicated region body
PF: predicated region fallthrough
CT: control target
= control target key end

     0   :  { %v21_v0 = vlaneseq  ;;  %v208_v1 = vmov 0.0|0.0   ;;  %vm209_vm0 = vmmov 0   ;;  %v210_v5 = vmov 0.0   ;;  %s262_s0 = inlined_call_operand.vmem [shape: s32[1,128], index: 0, kind: input, shape index: {}]   ;;  %s263_s1 = inlined_call_operand.vmem [shape: s32[1,128], index: 1, kind: input, shape index: {}]   ;;  %s264_s2 = inlined_call_operand.vmem [shape: f32[1,32], index: 2, kind: input, shape index: {}]   ;;  %s265_s3 = inlined_call_operand.<no memory space> [shape: f32[1,1], index: 3, kind: input, shape index: {}]   ;;  %s266_s4 = inlined_call_operand.hbm [shape: f32[1,128], index: 4, kind: output, shape index: {}]  }
   0x1   :  { %173 = vmatprep.subr.bf16.mxu0 %v208_v1  ;;  %v146_v2 = vld [vmem:[%s262_s0] ss:$0 sm:$0xff]  ;;  %170 = vmatprep.mubr.msk.f32.mxu0 %vm209_vm0, %v210_v5 }
   0x2   :  { %v147_v3 = vld [vmem:[%s263_s1] ss:$0 sm:$0xff]  ;;  %v22_v4 = vshrl.u32 %v21_v0, 7 }
   0x3   :  { %10 = vsyncpa [#allocation4], 0  ;;  %v211_v9 = vmov 1.0|1.0   ;;  %v54_v10 = vld [vmem:[%s264_s2] sm:$0x1]  ;;  %v56_v11 = vstv %s265_s3 }
   0x4   :  { %v23_v6 = vadd.s32 8, %v22_v4  ;;  %vm30_vm1 = vcmp.eq.s32.totalorder %v22_v4, %v146_v2  ;;  %vm38_vm2 = vcmp.eq.s32.totalorder %v22_v4, %v147_v3  ;;  %v24_v7 = vadd.s32 16, %v22_v4  ;;  %s212_s21 = smov [#allocation3]  }
   0x5   :  { %vm42_vm3 = vmor %vm30_vm1, %vm38_vm2  ;;  %v25_v8 = vadd.s32 24, %v22_v4  ;;  %vm57_vm15 = vcmask 261120   ;;  %s138_s22 = sshll.u32 %s212_s21, 4  ;;  %s139_s22 = int_to_ptr.vmem [resolvable:$true] %s138_s22 }
   0x6   :  { %vm31_vm4 = vcmp.eq.s32.totalorder %v23_v6, %v146_v2  ;;  %vm39_vm5 = vcmp.eq.s32.totalorder %v23_v6, %v147_v3  ;;  %vm32_vm6 = vcmp.eq.s32.totalorder %v24_v7, %v146_v2  ;;  %vm40_vm7 = vcmp.eq.s32.totalorder %v24_v7, %v147_v3  ;;  %s184_s23 = scalar_lea.vmem %s139_s22, 16  ;;  %s188_s24 = scalar_lea.vmem %s139_s22, 32 }
   0x7   :  { %vm43_vm8 = vmor %vm31_vm4, %vm39_vm5  ;;  %vm33_vm9 = vcmp.eq.s32.totalorder %v25_v8, %v146_v2  ;;  %vm41_vm10 = vcmp.eq.s32.totalorder %v25_v8, %v147_v3  ;;  %p185_p0 = scmp.ne.s32.totalorder %s139_s22, %s184_s23  ;;  %p189_p1 = scmp.lt.s32.totalorder %s139_s22, %s139_s22 }
   0x8   :  { %vm174_vm11 = vmpackc.low %vm43_vm8, %vm42_vm3  ;;  %p190_p2 = scmp.lt.s32.totalorder %s188_s24, %s184_s23 }
   0x9   :  { %175 = vmatpush3.bf16.msk.msra.mxu0 %vm174_vm11, %v211_v9  ;;  %vm44_vm12 = vmor %vm32_vm6, %vm40_vm7 }
   0xa   :  { %176 = vmatprep.subr.bf16.mxu0 %v208_v1  ;;  %vm45_vm13 = vmor %vm33_vm9, %vm41_vm10  ;;  %p191_p3 = por %p190_p2, %p189_p1 }
   0xb   :  { %vm177_vm14 = vmpackc.low %vm45_vm13, %vm44_vm12 }
   0xc   :  { %p192_p4 = pnand %p191_p3, %p185_p0 }
   0xd   :  { %178 = vmatpush3.bf16.msk.msra.mxu0 %vm177_vm14, %v211_v9 }
  0x10   :  { %171 = vmatmul.mubr.msk.f32.vlgmr.msra.gmra.mrb[0].mxu0 %vm57_vm15, %v54_v10 }
  0xe3   :  { %v127_v12 = vpop.f32.mrb[0].mxu0 }
  0xe4   :  { %v128_v13 = vadd.f32 %v127_v12, %v56_v11  ;;  %v172_v14 = vpop.f32.mrb[1].mxu0 }
  0xe6   :  { %131 = vst [vmem:[#allocation3] sm:$0x1] %v128_v13 }
  0xe7   :  { %195 = shalt.err (!%p192_p4)
}
  0xe8   :  { %s196_s26 = scalar_lea.hbm %s266_s4, 16 }
  0xe9   :  { %p197_p5 = scmp.ne.s32.totalorder %s266_s4, %s196_s26  ;;  %p200_p6 = scmp.lt.u32.totalorder %s196_s26, %s266_s4 }
  0xeb   :  { %p202_p7 = pnand %p200_p6, %p197_p5 }
  0xed   :  { %205 = shalt.err (!%p202_p7)
}
  0xee   :  { %141 = dma.vmem_to_hbm [thread:$0]  %s139_s22, 16, %s266_s4, [#allocation4]  }
  0xef   :  { %206 = dma.done.wait [#allocation4], 16  }
  0xf0   :  { %207 = vsyncadd [#allocation4], 4294967280 }
  0xf1   :  { %145 = vsyncpa [#allocation4], 1 }

</bundles_post_ra>
